<compile_context>
chip_gen: v6e
topology: v6e:2x2x1
jax: 0.10.0
libtpu: 0.0.40
codegen_flags: <defaults>
</compile_context>

<pallas_src>
import functools
import math

import jax
import jax.numpy as jnp
from jax import lax
from jax.experimental import pallas as pl
from jax.experimental.pallas import tpu as pltpu


# --------------------------------------------------------------------------- utils
def _round_up(x, m):
    return (x + m - 1) // m * m


def _padded_bytes(rows, cols, itemsize, sublane):
    """VMEM footprint of a 2-D tile after (sublane, 128)-lane padding."""
    return _round_up(rows, sublane) * _round_up(cols, 128) * itemsize


def _vmem_capacity_bytes():
    """Physical VMEM of this generation; conservative 64 MiB (v7x) fallback."""
    try:
        get_info = getattr(pltpu, "get_tpu_info", None)
        if get_info is not None:
            cap = getattr(get_info(), "vmem_capacity_bytes", None)
            if cap:
                return int(cap)
    except Exception:
        pass
    return 64 << 20


def _attn_vmem_bytes(tq, s_pad, ad, attn_itemsize):
    """Attention kernel per-step VMEM: double-buffered blocks + temporaries."""
    q_blk = _padded_bytes(tq, ad, 2, 16)
    kv_blk = _padded_bytes(s_pad, ad, 2, 16)
    out_v = _padded_bytes(tq, ad, 4, 8)
    out_a = _padded_bytes(tq, s_pad, attn_itemsize, 16 if attn_itemsize == 2 else 8)
    blocks = 2 * (q_blk + 2 * kv_blk + out_v + out_a)
    # Temporaries: scores / shifted scores / p / attn in f32 + bf16 attn copy.
    temps = 4 * _padded_bytes(tq, s_pad, 4, 8) + _padded_bytes(tq, s_pad, 2, 16)
    return blocks + temps


def _proj_vmem_bytes(ts, h, ad):
    """Projection kernel per-step VMEM: double-buffered blocks + temporaries."""
    x_blk = _padded_bytes(ts, h, 4, 8)
    w_blk = _padded_bytes(ad, h, 2, 16)
    o_blk = _padded_bytes(ts, ad, 2, 16)
    temps = 3 * (_padded_bytes(ts, h, 2, 16) + _padded_bytes(ts, ad, 4, 8))
    return 2 * 3 * (x_blk + o_blk) + 2 * 3 * w_blk + temps


def _vmem_limit_for(needed, vmem_cap):
    """Raise the scoped VMEM limit when the estimate exceeds the smallest default
    (16 MiB on v5e); clamp to physical VMEM minus headroom (v7x: 64 MiB)."""
    if needed <= (16 << 20):
        return None
    return int(min(needed + (8 << 20), vmem_cap - (2 << 20)))


def _select_tq(s_pad, ad, attn_itemsize, vmem_cap):
    if s_pad < 128:
        return s_pad
    # v7x (64 MiB physical VMEM): cap TQ at 256; v5e/v6e (128 MiB): allow 512.
    tq_cap = 512 if vmem_cap > (96 << 20) else 256
    budget = int(0.7 * vmem_cap)
    for cand in (512, 256, 128):
        if cand > tq_cap or cand > s_pad or s_pad % cand != 0:
            continue
        if _attn_vmem_bytes(cand, s_pad, ad, attn_itemsize) <= budget:
            return cand
    return 128


def _select_ts(s_pad, h, ad, vmem_cap):
    if s_pad < 128:
        return s_pad
    budget = int(0.7 * vmem_cap)
    for cand in (512, 256, 128):
        if cand > s_pad or s_pad % cand != 0:
            continue
        if _proj_vmem_bytes(cand, h, ad) <= budget:
            return cand
    return 128


# ------------------------------------------------------------------- kernel 1: QKV
def _qkv_projection_kernel(xq_ref, xk_ref, xv_ref,
                           wq_ref, wk_ref, wv_ref,
                           q_ref, k_ref, v_ref):
    # Blocks: x* (1, TS, H) f32, w* (Ad, H) bf16, outputs (1, TS, Ad) bf16.
    dn = (((1,), (1,)), ((), ()))   # contract the shared hidden dim (y = x @ W^T, no .T)
    for x_ref, w_ref, o_ref in ((xq_ref, wq_ref, q_ref),
                                (xk_ref, wk_ref, k_ref),
                                (xv_ref, wv_ref, v_ref)):
        x = x_ref[0].astype(jnp.bfloat16)                          # (TS, H)
        y = lax.dot_general(x, w_ref[...], dn,
                            preferred_element_type=jnp.float32)    # (TS, Ad), f32 acc
        o_ref[0] = y.astype(o_ref.dtype)


# ------------------------------------------------------------- kernel 2: attention
def _attention_kernel(q_ref, k_ref, v_ref, out_ref, attn_ref, *, s_valid, s_pad):
    # Blocks: q (1, TQ, Ad) bf16, k/v (1, S_pad, Ad) bf16,
    #         out (1, TQ, Ad) f32, attn (1, TQ, S_pad) attn_dtype.
    dn = (((1,), (1,)), ((), ()))
    q = q_ref[0]
    k = k_ref[0]
    v = v_ref[0]

    # scores = (q / sqrt(Ad)) @ k^T  -- the 1/sqrt(Ad) scale is folded into wq.
    scores = lax.dot_general(q, k, dn,
                             preferred_element_type=jnp.float32)   # (TQ, S_pad)

    if s_pad != s_valid:  # static branch: mask padded key positions
        col = lax.broadcasted_iota(jnp.int32, scores.shape, 1)
        scores = jnp.where(col < s_valid, scores, jnp.float32(-1e30))

    # Numerically-stable softmax; reciprocal goes to the otherwise-idle EUP slot.
    scores = scores - jnp.max(scores, axis=-1, keepdims=True)
    p = jnp.exp(scores)
    attn = p * pl.reciprocal(jnp.sum(p, axis=-1, keepdims=True), approx=True)

    # weighted_v = attn @ v   (bf16 MXU operands, f32 accumulation)
    wv = jnp.dot(attn.astype(jnp.bfloat16), v, preferred_element_type=jnp.float32)

    out_ref[0] = wv.astype(out_ref.dtype)
    attn_ref[0] = attn.astype(attn_ref.dtype)   # lane-dense (last dim = S_pad) store


# ------------------------------------------------------------------------ wrapper
def self_attention(query, key, value, wq, wk, wv, *, attn_dtype=jnp.bfloat16):
    """Pallas self-attention forward (eval mode).

    query/key/value: (B, S, H) float32
    wq/wk/wv:        (Ad, H)   float32   (nn.Linear weight layout, y = x @ W^T)
    attn_dtype:      dtype of the returned attention_score (bf16 halves the dominant
                     O(B*S^2) HBM writeback; pass jnp.float32 for exact dtype parity).
    returns: (weighted_v (B, S, Ad) f32, attention_score (B, S, S) attn_dtype)
    """
    B, S, H = query.shape
    Ad = wq.shape[0]
    inv_scale = 1.0 / math.sqrt(float(Ad))
    attn_itemsize = jnp.dtype(attn_dtype).itemsize
    vmem_cap = _vmem_capacity_bytes()

    # Fold the softmax scale into the (tiny) Q weight; cast MXU weights to bf16 once.
    wq_b = (wq * inv_scale).astype(jnp.bfloat16)
    wk_b = wk.astype(jnp.bfloat16)
    wv_b = wv.astype(jnp.bfloat16)

    # Sequence padding: full-extent blocks for small S, otherwise pad to a multiple
    # of 128 (padded keys are masked inside the attention kernel).
    if S < 128 or S % 128 == 0:
        s_pad = S
    else:
        s_pad = _round_up(S, 128)
    if s_pad != S:
        pad = ((0, 0), (0, s_pad - S), (0, 0))
        query = jnp.pad(query, pad)
        key = jnp.pad(key, pad)
        value = jnp.pad(value, pad)

    # ---------------------------------------------------------------- QKV projection
    ts = _select_ts(s_pad, H, Ad, vmem_cap)
    n_s = s_pad // ts

    x_spec = pl.BlockSpec((1, ts, H), lambda b, si: (b, si, 0))
    w_spec = pl.BlockSpec((Ad, H), lambda b, si: (0, 0))
    p_spec = pl.BlockSpec((1, ts, Ad), lambda b, si: (b, si, 0))

    proj_cost = pl.CostEstimate(
        flops=int(6 * B * s_pad * H * Ad),
        transcendentals=0,
        bytes_accessed=int(3 * B * s_pad * H * 4 + 3 * Ad * H * 2
                           + 3 * B * s_pad * Ad * 2))

    q_p, k_p, v_p = pl.pallas_call(
        _qkv_projection_kernel,
        out_shape=tuple(jax.ShapeDtypeStruct((B, s_pad, Ad), jnp.bfloat16)
                        for _ in range(3)),
        grid_spec=pltpu.PrefetchScalarGridSpec(
            num_scalar_prefetch=0,
            grid=(B, n_s),
            in_specs=[x_spec, x_spec, x_spec, w_spec, w_spec, w_spec],
            out_specs=(p_spec, p_spec, p_spec)),
        compiler_params=pltpu.CompilerParams(
            dimension_semantics=("parallel", "parallel"),
            vmem_limit_bytes=_vmem_limit_for(_proj_vmem_bytes(ts, H, Ad), vmem_cap)),
        cost_estimate=proj_cost,
    )(query, key, value, wq_b, wk_b, wv_b)

    # -------------------------------------------------------------------- attention
    tq = _select_tq(s_pad, Ad, attn_itemsize, vmem_cap)
    n_q = s_pad // tq

    q_spec = pl.BlockSpec((1, tq, Ad), lambda b, qi: (b, qi, 0))
    kv_spec = pl.BlockSpec((1, s_pad, Ad), lambda b, qi: (b, 0, 0))  # no re-DMA across q-tiles
    out_v_spec = pl.BlockSpec((1, tq, Ad), lambda b, qi: (b, qi, 0))
    out_a_spec = pl.BlockSpec((1, tq, s_pad), lambda b, qi: (b, qi, 0))

    attn_cost = pl.CostEstimate(
        flops=int(4 * B * s_pad * s_pad * Ad),
        transcendentals=int(B * s_pad * s_pad),
        bytes_accessed=int(3 * B * s_pad * Ad * 2 + B * s_pad * Ad * 4
                           + B * s_pad * s_pad * attn_itemsize))

    weighted_v, attn = pl.pallas_call(
        functools.partial(_attention_kernel, s_valid=S, s_pad=s_pad),
        out_shape=(jax.ShapeDtypeStruct((B, s_pad, Ad), jnp.float32),
                   jax.ShapeDtypeStruct((B, s_pad, s_pad), attn_dtype)),
        grid_spec=pltpu.PrefetchScalarGridSpec(
            num_scalar_prefetch=0,
            grid=(B, n_q),
            in_specs=[q_spec, kv_spec, kv_spec],
            out_specs=(out_v_spec, out_a_spec)),
        compiler_params=pltpu.CompilerParams(
            # No cross-q-tile scratch dependency anymore -> both axes can shard
            # across the two v7x TensorCores (no-op on single-TC v5e/v6e).
            dimension_semantics=("parallel", "parallel"),
            vmem_limit_bytes=_vmem_limit_for(
                _attn_vmem_bytes(tq, s_pad, Ad, attn_itemsize), vmem_cap)),
        cost_estimate=attn_cost,
    )(q_p, k_p, v_p)

    if s_pad != S:
        weighted_v = weighted_v[:, :S, :]
        attn = attn[:, :S, :S]
    return weighted_v, attn


# ---------------------------------------------------------------------- reference
def _reference(query, key, value, wq, wk, wv):
    q = query @ wq.T
    k = key @ wk.T
    v = value @ wv.T
    scale = jnp.sqrt(jnp.float32(wq.shape[0]))
    scores = jnp.einsum("bqd,bkd->bqk", q, k) / scale
    attn = jax.nn.softmax(scores, axis=-1)
    return jnp.einsum("bqk,bkd->bqd", attn, v), attn


if __name__ == "__main__":
    # Small shapes consistent with the module: hidden_dim=32, n_head=4 -> attention_dim=8
    B, S, H, N_HEAD = 2, 8, 32, 4
    AD = H // N_HEAD

    key0 = jax.random.PRNGKey(0)
    k1, k2, k3, k4, k5, k6 = jax.random.split(key0, 6)

    query = jax.random.normal(k1, (B, S, H), dtype=jnp.float32)
    key_ = jax.random.normal(k2, (B, S, H), dtype=jnp.float32)
    value = jax.random.normal(k3, (B, S, H), dtype=jnp.float32)

    # Deterministic weight init (stand-in for init_weight): small normal.
    wq = 0.1 * jax.random.normal(k4, (AD, H), dtype=jnp.float32)
    wk = 0.1 * jax.random.normal(k5, (AD, H), dtype=jnp.float32)
    wv = 0.1 * jax.random.normal(k6, (AD, H), dtype=jnp.float32)

    weighted_v, attn_score = self_attention(query, key_, value, wq, wk, wv)
    jax.block_until_ready((weighted_v, attn_score))

    # bf16 MXU operands / bf16 attention output / approx reciprocal -> compare against
    # the f32 reference with a correspondingly relaxed (but still tight) tolerance.
    ref_v, ref_a = _reference(query, key_, value, wq, wk, wv)
    assert jnp.allclose(weighted_v, ref_v, atol=2e-2, rtol=2e-2), \
        float(jnp.max(jnp.abs(weighted_v - ref_v)))
    assert jnp.allclose(attn_score.astype(jnp.float32), ref_a, atol=2e-2, rtol=2e-2), \
        float(jnp.max(jnp.abs(attn_score.astype(jnp.float32) - ref_a)))

    print("KERNEL_OK")
</pallas_src>

<mosaic_0001>
module attributes {stable_mosaic.version = 11 : i64} {
  func.func @_qkv_projection_kernel(%arg0: i32, %arg1: i32, %arg2: memref<1x8x32xf32, #tpu.memory_space<vmem>>, %arg3: memref<1x8x32xf32, #tpu.memory_space<vmem>>, %arg4: memref<1x8x32xf32, #tpu.memory_space<vmem>>, %arg5: memref<8x32xbf16, #tpu.memory_space<vmem>>, %arg6: memref<8x32xbf16, #tpu.memory_space<vmem>>, %arg7: memref<8x32xbf16, #tpu.memory_space<vmem>>, %arg8: memref<1x8x8xbf16, #tpu.memory_space<vmem>>, %arg9: memref<1x8x8xbf16, #tpu.memory_space<vmem>>, %arg10: memref<1x8x8xbf16, #tpu.memory_space<vmem>>) attributes {dimension_semantics = [#tpu.dimension_semantics<parallel>, #tpu.dimension_semantics<parallel>], iteration_bounds = array<i64: 2, 1>, scalar_prefetch = 0 : i64, scratch_operands = 0 : i64, tpu.core_type = #tpu.core_type<tc>, window_params = [{transform_indices = @transform_0, window_bounds = array<i64: 1, 8, 32>}, {transform_indices = @transform_1, window_bounds = array<i64: 1, 8, 32>}, {transform_indices = @transform_2, window_bounds = array<i64: 1, 8, 32>}, {pipeline_mode = #tpu.pipeline_mode<synchronous>, transform_indices = @transform_3, window_bounds = array<i64: 8, 32>}, {pipeline_mode = #tpu.pipeline_mode<synchronous>, transform_indices = @transform_4, window_bounds = array<i64: 8, 32>}, {pipeline_mode = #tpu.pipeline_mode<synchronous>, transform_indices = @transform_5, window_bounds = array<i64: 8, 32>}, {transform_indices = @transform_6, window_bounds = array<i64: 1, 8, 8>}, {transform_indices = @transform_7, window_bounds = array<i64: 1, 8, 8>}, {transform_indices = @transform_8, window_bounds = array<i64: 1, 8, 8>}]} {
    %c0 = arith.constant 0 : index
    %c0_0 = arith.constant 0 : index
    %c0_1 = arith.constant 0 : index
    %0 = vector.load %arg2[%c0, %c0_0, %c0_1] : memref<1x8x32xf32, #tpu.memory_space<vmem>>, vector<1x8x32xf32>
    %1 = vector.shape_cast %0 : vector<1x8x32xf32> to vector<8x32xf32>
    %2 = arith.truncf %1 : vector<8x32xf32> to vector<8x32xbf16>
    %c0_2 = arith.constant 0 : index
    %c0_3 = arith.constant 0 : index
    %3 = vector.load %arg5[%c0_2, %c0_3] : memref<8x32xbf16, #tpu.memory_space<vmem>>, vector<8x32xbf16>
    %cst = arith.constant dense<0.000000e+00> : vector<8x8xf32>
    %4 = tpu.matmul %2, %3, %cst {dimension_numbers = #tpu.dot_dimension_numbers<[1], [1], [0], [0], [0, 0, 1, 0], [], []>} : vector<8x32xbf16>, vector<8x32xbf16>, vector<8x8xf32> -> vector<8x8xf32>
    %5 = arith.truncf %4 : vector<8x8xf32> to vector<8x8xbf16>
    %c0_4 = arith.constant 0 : index
    %c0_5 = arith.constant 0 : index
    %c0_6 = arith.constant 0 : index
    %6 = vector.load %arg8[%c0_4, %c0_5, %c0_6] : memref<1x8x8xbf16, #tpu.memory_space<vmem>>, vector<1x8x8xbf16>
    %7 = vector.shape_cast %6 : vector<1x8x8xbf16> to vector<8x8xbf16>
    %8 = vector.shape_cast %5 : vector<8x8xbf16> to vector<1x8x8xbf16>
    tpu.vector_store %arg8[%c0_4, %c0_5, %c0_6], %8 {strides = array<i32>} : memref<1x8x8xbf16, #tpu.memory_space<vmem>>, vector<1x8x8xbf16>,
    %c0_7 = arith.constant 0 : index
    %c0_8 = arith.constant 0 : index
    %c0_9 = arith.constant 0 : index
    %9 = vector.load %arg3[%c0_7, %c0_8, %c0_9] : memref<1x8x32xf32, #tpu.memory_space<vmem>>, vector<1x8x32xf32>
    %10 = vector.shape_cast %9 : vector<1x8x32xf32> to vector<8x32xf32>
    %11 = arith.truncf %10 : vector<8x32xf32> to vector<8x32xbf16>
    %c0_10 = arith.constant 0 : index
    %c0_11 = arith.constant 0 : index
    %12 = vector.load %arg6[%c0_10, %c0_11] : memref<8x32xbf16, #tpu.memory_space<vmem>>, vector<8x32xbf16>
    %cst_12 = arith.constant dense<0.000000e+00> : vector<8x8xf32>
    %13 = tpu.matmul %11, %12, %cst_12 {dimension_numbers = #tpu.dot_dimension_numbers<[1], [1], [0], [0], [0, 0, 1, 0], [], []>} : vector<8x32xbf16>, vector<8x32xbf16>, vector<8x8xf32> -> vector<8x8xf32>
    %14 = arith.truncf %13 : vector<8x8xf32> to vector<8x8xbf16>
    %c0_13 = arith.constant 0 : index
    %c0_14 = arith.constant 0 : index
    %c0_15 = arith.constant 0 : index
    %15 = vector.load %arg9[%c0_13, %c0_14, %c0_15] : memref<1x8x8xbf16, #tpu.memory_space<vmem>>, vector<1x8x8xbf16>
    %16 = vector.shape_cast %15 : vector<1x8x8xbf16> to vector<8x8xbf16>
    %17 = vector.shape_cast %14 : vector<8x8xbf16> to vector<1x8x8xbf16>
    tpu.vector_store %arg9[%c0_13, %c0_14, %c0_15], %17 {strides = array<i32>} : memref<1x8x8xbf16, #tpu.memory_space<vmem>>, vector<1x8x8xbf16>,
    %c0_16 = arith.constant 0 : index
    %c0_17 = arith.constant 0 : index
    %c0_18 = arith.constant 0 : index
    %18 = vector.load %arg4[%c0_16, %c0_17, %c0_18] : memref<1x8x32xf32, #tpu.memory_space<vmem>>, vector<1x8x32xf32>
    %19 = vector.shape_cast %18 : vector<1x8x32xf32> to vector<8x32xf32>
    %20 = arith.truncf %19 : vector<8x32xf32> to vector<8x32xbf16>
    %c0_19 = arith.constant 0 : index
    %c0_20 = arith.constant 0 : index
    %21 = vector.load %arg7[%c0_19, %c0_20] : memref<8x32xbf16, #tpu.memory_space<vmem>>, vector<8x32xbf16>
    %cst_21 = arith.constant dense<0.000000e+00> : vector<8x8xf32>
    %22 = tpu.matmul %20, %21, %cst_21 {dimension_numbers = #tpu.dot_dimension_numbers<[1], [1], [0], [0], [0, 0, 1, 0], [], []>} : vector<8x32xbf16>, vector<8x32xbf16>, vector<8x8xf32> -> vector<8x8xf32>
    %23 = arith.truncf %22 : vector<8x8xf32> to vector<8x8xbf16>
    %c0_22 = arith.constant 0 : index
    %c0_23 = arith.constant 0 : index
    %c0_24 = arith.constant 0 : index
    %24 = vector.load %arg10[%c0_22, %c0_23, %c0_24] : memref<1x8x8xbf16, #tpu.memory_space<vmem>>, vector<1x8x8xbf16>
    %25 = vector.shape_cast %24 : vector<1x8x8xbf16> to vector<8x8xbf16>
    %26 = vector.shape_cast %23 : vector<8x8xbf16> to vector<1x8x8xbf16>
    tpu.vector_store %arg10[%c0_22, %c0_23, %c0_24], %26 {strides = array<i32>} : memref<1x8x8xbf16, #tpu.memory_space<vmem>>, vector<1x8x8xbf16>,
    return
  }
  func.func @transform_0(%arg0: i32, %arg1: i32) -> (i32, i32, i32) {
    %c0_i32 = arith.constant 0 : i32
    %c0_i32_0 = arith.constant 0 : i32
    return %arg0, %arg1, %c0_i32 : i32, i32, i32
  }
  func.func @transform_1(%arg0: i32, %arg1: i32) -> (i32, i32, i32) {
    %c0_i32 = arith.constant 0 : i32
    %c0_i32_0 = arith.constant 0 : i32
    return %arg0, %arg1, %c0_i32 : i32, i32, i32
  }
  func.func @transform_2(%arg0: i32, %arg1: i32) -> (i32, i32, i32) {
    %c0_i32 = arith.constant 0 : i32
    %c0_i32_0 = arith.constant 0 : i32
    return %arg0, %arg1, %c0_i32 : i32, i32, i32
  }
  func.func @transform_3(%arg0: i32, %arg1: i32) -> (i32, i32) {
    %c0_i32 = arith.constant 0 : i32
    %c0_i32_0 = arith.constant 0 : i32
    %c0_i32_1 = arith.constant 0 : i32
    return %c0_i32, %c0_i32_0 : i32, i32
  }
  func.func @transform_4(%arg0: i32, %arg1: i32) -> (i32, i32) {
    %c0_i32 = arith.constant 0 : i32
    %c0_i32_0 = arith.constant 0 : i32
    %c0_i32_1 = arith.constant 0 : i32
    return %c0_i32, %c0_i32_0 : i32, i32
  }
  func.func @transform_5(%arg0: i32, %arg1: i32) -> (i32, i32) {
    %c0_i32 = arith.constant 0 : i32
    %c0_i32_0 = arith.constant 0 : i32
    %c0_i32_1 = arith.constant 0 : i32
    return %c0_i32, %c0_i32_0 : i32, i32
  }
  func.func @transform_6(%arg0: i32, %arg1: i32) -> (i32, i32, i32) {
    %c0_i32 = arith.constant 0 : i32
    %c0_i32_0 = arith.constant 0 : i32
    return %arg0, %arg1, %c0_i32 : i32, i32, i32
  }
  func.func @transform_7(%arg0: i32, %arg1: i32) -> (i32, i32, i32) {
    %c0_i32 = arith.constant 0 : i32
    %c0_i32_0 = arith.constant 0 : i32
    return %arg0, %arg1, %c0_i32 : i32, i32, i32
  }
  func.func @transform_8(%arg0: i32, %arg1: i32) -> (i32, i32, i32) {
    %c0_i32 = arith.constant 0 : i32
    %c0_i32_0 = arith.constant 0 : i32
    return %arg0, %arg1, %c0_i32 : i32, i32, i32
  }
}

</mosaic_0001>

<bundles_post_ra>
// kernel: tpu_custom_call.1
= control target key start
LH: loop header
LB: loop body
LE: loop exit
PB: predicated region body
PF: predicated region fallthrough
CT: control target
= control target key end

     0   :  { %s1633_s0 = inlined_call_operand.hbm [shape: f32[2,8,32], index: 0, kind: input, shape index: {}]   ;;  %s1634_s1 = inlined_call_operand.hbm [shape: f32[2,8,32], index: 1, kind: input, shape index: {}]   ;;  %s1635_s2 = inlined_call_operand.hbm [shape: f32[2,8,32], index: 2, kind: input, shape index: {}]   ;;  %s1636_s3 = inlined_call_operand.vmem [shape: bf16[8,32], index: 3, kind: input, shape index: {}]   ;;  %s1637_s4 = inlined_call_operand.hbm [shape: bf16[8,32], index: 4, kind: input, shape index: {}]   ;;  %s1638_s5 = inlined_call_operand.vmem [shape: bf16[8,32], index: 5, kind: input, shape index: {}]   ;;  %s1639_s6 = inlined_call_operand.hbm [shape: bf16[2,8,8], index: 6, kind: output, shape index: {0}]   ;;  %s1640_s7 = inlined_call_operand.hbm [shape: bf16[2,8,8], index: 7, kind: output, shape index: {1}]   ;;  %s1641_s8 = inlined_call_operand.hbm [shape: bf16[2,8,8], index: 8, kind: output, shape index: {2}]  }
   0x1   :  { %1655 = sst [smem:[#allocation25_spill]] %s1634_s1 }
   0x2   :  { %14 = vsyncpa [#allocation3], 0 }
   0x3   :  { %16 = vsyncpa [#allocation3 + $0x1], 0 }
   0x4   :  { %17 = vsyncpa [#allocation6], 0 }
   0x5   :  { %19 = vsyncpa [#allocation6 + $0x1], 0 }
   0x6   :  { %20 = vsyncpa [#allocation9], 0 }
   0x7   :  { %21 = vsyncpa [#allocation4], 0 }
   0x8   :  { %23 = vsyncpa [#allocation4 + $0x1], 0 }
   0x9   :  { %24 = vsyncpa [#allocation12], 0 }
   0xa   :  { %26 = vsyncpa [#allocation12 + $0x1], 0  ;;  %s1316_s27 = smov 0   ;;  %s1318_s28 = smov 0  }
   0xb   :  { %s1320_s29 = smov 0   ;;  %s1322_s30 = smov 0  }
   0xc   :  { %s1324_s9 = smov 0   ;;  %s1326_s10 = smov 0  }
   0xd LB: > { %1656 = sst [smem:[#allocation19_spill]] %s1240_s27  ;;  %s44_s11 = sadd.s32 1, %s1256_s9  ;;  %s1260_s10 = sphi %s1326_s10, %s32_s10   ;;  %s1256_s9 = sphi %s1324_s9, %s1684_s9   ;;  %s1252_s30 = sphi %s1322_s30, %s1683_s30   ;;  %s1248_s29 = sphi %s1320_s29, %s1687_s29   ;;  %s1244_s28 = sphi %s1318_s28, %s1686_s28   ;;  %s1240_s27 = sphi %s1316_s27, %s1685_s27  }
   0xe   : > { %1657 = sst [smem:[#allocation20_spill]] %s1256_s9  ;;  %s53_s12 = sadd.s32 1, %s1248_s29 }
   0xf   : > { %1658 = sst [smem:[#allocation21_spill]] %s1260_s10  ;;  %p46_p0 = scmp.ge.s32.totalorder %s44_s11, 2 }
  0x10   : > { %p60_p1 = scmp.ne.s32.totalorder %s1248_s29, %s1244_s28  ;;  %p61_p2 = scmp.eq.s32.totalorder %s1260_s10, 0 }
  0x11   : > { %s1689_s11 = smov (%p46_p0, %s44_s11), 0  ;;  %p952_p5 = scmp.lt.s32.totalorder %s1260_s10, 2 }
  0x12   : > { %1659 = sst [smem:[#allocation22_spill]] %s1689_s11  ;;  %p62_p4 = por %p61_p2, %p60_p1 }
  0x13   : > { %s48_s13 = ssub.s32 %s1256_s9, %s1689_s11  ;;  %s1642_s14 = sand.u32 1, %s1248_s29  }
  0x14   : > { %p51_p6 = scmp.eq.s32.totalorder %s48_s13, 0  ;;  %s1363_s15 = sshll.u32 %s1642_s14, 3 }
  0x15   : > { %s1366_s16 = sshll.u32 %s1256_s9, 7  ;;  %p1368_p7 = pnand %p952_p5, %p62_p4 }
  0x16   : > { %s1373_s18 = scalar_select %p51_p6, %s1248_s29, %s53_s12  }
  0x17   : > { %s329_s19 = sand.u32 1, %s1260_s10   ;;  %s1662_s1 = sld [smem:[#allocation25_spill]] }
  0x18   : > { %1661 = sst [smem:[#allocation23_spill]] %s1373_s18  ;;  %s333_s23 = scalar_lea.vmem [#allocation5], %s1363_s15 }
  0x19   : > { %s341_s24 = sshll.u32 %s333_s23, 4  ;;  %s1381_s25 = scalar_lea.sflag [#allocation6], %s329_s19  ;;  %s342_s24 = int_to_ptr.vmem [resolvable:$true] %s341_s24 }
  0x1a   : > { %p1651_p8 = pneg %p1368_p7  ;;  %s1019_s26 = scalar_lea.vmem %s342_s24, 128 }
  0x1b   : > { %p1020_p9 = scmp.ne.s32.totalorder %s342_s24, %s1019_s26  ;;  %s1262_s12 = smov [#allocation5]  }
  0x1c   : > { %s1024_s13 = sshll.u32 %s1262_s12, 4  ;;  %s1025_s13 = int_to_ptr.vmem [resolvable:$false] %s1024_s13 }
  0x1d   : > { %s339_s22 = scalar_lea.hbm %s1662_s1, %s1366_s16  ;;  %p1022_p10 = pnand %p1020_p9, %p1651_p8 }
  0x1e   : > { %s1026_s14 = scalar_lea.vmem %s1025_s13, 256  ;;  %p1027_p12 = scmp.lt.s32.totalorder %s342_s24, %s1025_s13 }
  0x1f   : > { %p1023_p11 = pneg %p1022_p10  ;;  %p1028_p13 = scmp.lt.s32.totalorder %s1026_s14, %s1019_s26 }
  0x21   : > { %p1029_p0 = por %p1028_p13, %p1027_p12 }
  0x23   : > { %p1030_p2 = pnand %p1029_p0, %p1023_p11 }
  0x25   : > { %1033 = shalt.err (!%p1030_p2)
}
  0x26   : > { %937 = dma.hbm_to_vmem [thread:$0]  (!%p1368_p7), %s339_s22, 128, %s342_s24, %s1381_s25  }
  0x27   : > { %s1392_s19 = sadd.s32 4294967295, %s1260_s10   ;;  %s1643_s14 = sadd.s32 4294967294, %s1260_s10  }
  0x28   : > { %p66_p4 = scmp.ne.s32.totalorder %s1244_s28, %s1240_s27  ;;  %p1650_p5 = scmp.eq.s32.totalorder %s1392_s19, 0 }
  0x29   : > { %p211_p6 = scmp.eq.s32.totalorder %s1392_s19, 1  ;;  %p217_p9 = scmp.eq.s32.totalorder %s1643_s14, 1 }
  0x2a   : > { %p859_p10 = scmp.ge.s32.totalorder %s1260_s10, 1  ;;  %p1404_p11 = por %p1650_p5, %p66_p4 }
  0x2b   : > { %p1411_p12 = por %p211_p6, %p60_p1  ;;  %p1415_p13 = por %p217_p9, %p66_p4 }
  0x2c   : > { %s1663_s20 = scalar_select %p1404_p11, 1, 0 }
  0x2d   : > { %s1664_s21 = scalar_select %p1411_p12, 1, 0 }
  0x2e   : > { %s1665_s22 = scalar_select %p1415_p13, 1, 0 }
  0x2f   : > { %p280_p0 = scmp.lt.s32.totalorder %s1260_s10, 3  ;;  %s1263_s24 = smov [#allocation8]  }
  0x30   : > { %1666 = sst [smem:[#allocation24_spill]] %s1665_s22  ;;  %s296_s26 = sshll.u32 %s1263_s24, 4  ;;  %s1424_s26 = int_to_ptr.vmem [resolvable:$true] %s296_s26 }
  0x31   : > { %p1420_p2 = pnand %p859_p10, %p280_p0  ;;  %s320_s14 = scalar_lea.hbm %s1633_s0, %s1366_s16 }
  0x32   : > { %s314_s1 = scalar_lea.vmem [#allocation2], %s1363_s15  ;;  %s1669_s18 = sand.u32 1, %s1248_s29  }
  0x33   : > { %s1667_s23 = scalar_select %p1420_p2, 1, 0 }
  0x34   : > { %p927_p1 = pneg %p1420_p2  ;;  %s322_s11 = sshll.u32 %s314_s1, 4  ;;  %s323_s11 = int_to_ptr.vmem [resolvable:$true] %s322_s11 }
  0x35   : > { %s311_s10 = scalar_lea.sflag [#allocation3], %s1669_s18  ;;  %s1047_s22 = scalar_lea.vmem %s323_s11, 128 }
  0x36   : > { %p1435_p4 = pnand %p927_p1, %p1650_p5  ;;  %p1048_p6 = scmp.ne.s32.totalorder %s323_s11, %s1047_s22 }
  0x37   : > { %s1264_s24 = smov [#allocation2]  }
  0x38   : > { %p1050_p9 = pnand %p1048_p6, %p1651_p8  ;;  %s1052_s27 = sshll.u32 %s1264_s24, 4  ;;  %s1053_s27 = int_to_ptr.vmem [resolvable:$false] %s1052_s27 }
  0x39   : > { %s1054_s12 = scalar_lea.vmem %s1053_s27, 256  ;;  %p1055_p0 = scmp.lt.s32.totalorder %s323_s11, %s1053_s27 }
  0x3a   : > { %p1051_p10 = pneg %p1050_p9  ;;  %p1056_p3 = scmp.lt.s32.totalorder %s1054_s12, %s1047_s22 }
  0x3c   : > { %p1057_p13 = por %p1056_p3, %p1055_p0 }
  0x3e   : > { %p1058_p1 = pnand %p1057_p13, %p1051_p10 }
  0x40   : > { %1061 = shalt.err (!%p1058_p1)
}
  0x41   : > { %934 = dma.hbm_to_vmem [thread:$0]  (!%p1368_p7), %s320_s14, 128, %s323_s11, %s311_s10  }
  0x42   : > { %p1064_p5 = pneg %p1435_p4  ;;  %s1073_s1 = scalar_lea.vmem %s1424_s26, 64 }
  0x43   : > { %p1074_p6 = scmp.ne.s32.totalorder %s1424_s26, %s1073_s1  ;;  %p1081_p12 = scmp.lt.s32.totalorder %s1424_s26, %s1424_s26 }
  0x44   : > { %p1082_p11 = scmp.lt.s32.totalorder %s1073_s1, %s1073_s1 }
  0x45   : > { %p1076_p9 = pnand %p1074_p6, %p1064_p5 }
  0x46   : > { %p1083_p2 = por %p1082_p11, %p1081_p12 }
  0x47   : > { %p1077_p8 = pneg %p1076_p9 }
  0x49   : > { %p1084_p3 = pnand %p1083_p2, %p1077_p8 }
  0x4b   : > { %1087 = shalt.err (!%p1084_p3)
}
  0x4c   : > { %930 = dma.hbm_to_vmem [thread:$0]  (!%p1435_p4), %s1637_s4, 64, %s1424_s26, [#allocation9]  }
  0x4d   : > { %s358_s14 = scalar_lea.hbm %s1635_s2, %s1366_s16  ;;  %s352_s22 = scalar_lea.vmem [#allocation7], %s1363_s15 }
  0x4e   : > { %s360_s13 = sshll.u32 %s352_s22, 4  ;;  %p1670_p5 = pneg %p1368_p7  ;;  %s361_s13 = int_to_ptr.vmem [resolvable:$true] %s360_s13 }
  0x4f   : > { %s1101_s24 = scalar_lea.vmem %s361_s13, 128  ;;  %s1265_s9 = smov [#allocation7]  }
  0x50   : > { %p1102_p8 = scmp.ne.s32.totalorder %s361_s13, %s1101_s24  ;;  %s1106_s12 = sshll.u32 %s1265_s9, 4  ;;  %s1107_s12 = int_to_ptr.vmem [resolvable:$false] %s1106_s12 }
  0x51   : > { %s1108_s1 = scalar_lea.vmem %s1107_s12, 256  ;;  %p1109_p13 = scmp.lt.s32.totalorder %s361_s13, %s1107_s12 }
  0x52   : > { %p1104_p11 = pnand %p1102_p8, %p1670_p5  ;;  %p1110_p2 = scmp.lt.s32.totalorder %s1108_s1, %s1101_s24 }
  0x54   : > { %p1105_p12 = pneg %p1104_p11  ;;  %p1111_p4 = por %p1110_p2, %p1109_p13 }
  0x56   : > { %p1112_p10 = pnand %p1111_p4, %p1105_p12 }
  0x58   : > { %1115 = shalt.err (!%p1112_p10)
}
  0x59   : > { %940 = dma.hbm_to_vmem [thread:$0]  (!%p1368_p7), %s358_s14, 128, %s361_s13, %s1381_s25  }
  0x5a   : > { %p1671_p0 = scmp.ne.s32.totalorder %s1667_s23, 0 }
  0x5b   : > { %s1472_s15 = sand.u32 (!%p1671_p0), 1, %s1244_s28   ;;  %p1672_p1 = scmp.ne.s32.totalorder (!%p1671_p0), %s1663_s20, 0 }
  0x5c   : > { %369 = sbr.rel (%p1671_p0) target bundleno = 368 (0x170), region = 44  ;;  %s1475_s16 = sshll.u32 (!%p1671_p0), %s1472_s15, 3 }
  0x5d   : > { %s372_s26 = scalar_lea.sflag (!%p1671_p0), [#allocation3], %s1472_s15  ;;  %s375_s27 = scalar_lea.vmem (!%p1671_p0), [#allocation2], %s1475_s16 }
  0x61   : > { %1219 = dma.done.wait (%p1672_p1), %s372_s26, 128  }
  0x62   : > { %1221 = vsyncadd (%p1672_p1), %s372_s26, 4294967168  ;;  %s380_s17 = sand.u32 1, %s1392_s19   ;;  %s384_s23 = scalar_lea.vmem [#allocation5], %s1475_s16 }
  0x63   : > { %s381_s25 = scalar_lea.sflag [#allocation6], %s380_s17 }
  0x64   : > { %1223 = dma.done.wait (%p1672_p1), %s381_s25, 256  }
  0x65   : > { %1225 = vsyncadd (%p1672_p1), %s381_s25, 4294967040  ;;  %s393_s18 = scalar_lea.vmem [#allocation7], %s1475_s16  ;;  %p1673_p7 = scmp.eq.s32.totalorder %s1392_s19, 0 }
  0x67   : > { %1227 = dma.done.wait (%p1673_p7), [#allocation9], 64   ;;  %p1674_p6 = pmov %p1673_p7 }
  0x68   : > { %v1266_v0 = vmov 0.0   ;;  %vm1267_vm0 = vmmov 0   ;;  %vm454_vm1 = vcmask 261120   ;;  %v453_v1 = vld [vmem:[%s1636_s3] sm:$0xf]  ;;  %v504_v6 = vld [vmem:[%s384_s23] sm:$0xff] }
  0x69   : > { %1229 = vsyncadd (%p1674_p6), [#allocation9], 4294967232  ;;  %893 = vmatprep.subr.bf16.mxu0 %v1266_v0  ;;  %899 = vmatprep.subr.bf16.mxu1 %v1266_v0  ;;  %v506_v2 = vld [vmem:[#allocation8] sm:$0xf]  ;;  %v459_v3 = vsel %vm454_vm1, %v453_v1, 0  ;;  %v451_v5 = vld [vmem:[%s375_s27] sm:$0xff]  ;;  %v505_v9 = vpack.c.bf16 %v504_v6, %v504_v6 }
  0x6a   : > { %895 = vmatprep.mubr.msk.bf16.mxu0 %vm1267_vm0, %v1266_v0  ;;  %901 = vmatprep.mubr.msk.bf16.mxu1 %vm1267_vm0, %v1266_v0  ;;  %v511_v4 = vsel %vm454_vm1, %v506_v2, 0  ;;  %v557_v7 = vld [vmem:[%s1638_s5] sm:$0xf]  ;;  %v452_v8 = vpack.c.bf16 %v451_v5, %v451_v5  ;;  %s1512_s22 = sshll.u32 %s1472_s15, 2  ;;  %s1515_s13 = sshll.u32 %s1252_s30, 6  ;;  %vm502_vm2 = vcmask 60416  }
  0x6b   : > { %894 = vmatpush3.bf16.xpose.msra.mxu0 %v459_v3  ;;  %900 = vmatpush3.bf16.xpose.msra.mxu1 %v511_v4  ;;  %v562_v10 = vsel %vm454_vm1, %v557_v7, 0  ;;  %v555_v11 = vld [vmem:[%s393_s18] sm:$0xff]  ;;  %s442_s24 = scalar_lea.vmem [#allocation11], %s1512_s22  ;;  %s435_s12 = scalar_lea.vmem [#allocation10], %s1512_s22 }
  0x6c   : > { %905 = vmatprep.subr.bf16.mxu0 %v1266_v0  ;;  %v556_v12 = vpack.c.bf16 %v555_v11, %v555_v11  ;;  %s645_s9 = sshll.u32 %s442_s24, 4  ;;  %s631_s1 = sshll.u32 %s435_s12, 4  ;;  %s1525_s9 = int_to_ptr.vmem [resolvable:$true] %s645_s9  ;;  %s1533_s1 = int_to_ptr.vmem [resolvable:$true] %s631_s1 }
  0x6d   : > { %s1523_s27 = scalar_lea.hbm %s1640_s7, %s1515_s13  ;;  %s1531_s23 = scalar_lea.hbm %s1639_s6, %s1515_s13 }
  0x6e   : > { %s1539_s18 = scalar_lea.sflag [#allocation12], %s380_s17  ;;  %s1116_s10 = scalar_lea.vmem %s1525_s9, 64 }
  0x6f   : > { %p1117_p9 = scmp.ne.s32.totalorder %s1525_s9, %s1116_s10  ;;  %p1675_p3 = scmp.ne.s32.totalorder %s1664_s21, 0 }
  0x70   : > { %s1268_s20 = smov [#allocation11]  }
  0x71   : > { %p1118_p8 = pnand %p1117_p9, %p1675_p3  ;;  %s1120_s11 = sshll.u32 %s1268_s20, 4  ;;  %s1121_s11 = int_to_ptr.vmem [resolvable:$false] %s1120_s11 }
  0x72   : > { %896 = vmatmul.mubr.msk.bf16.vlgmr.msra.gmra.mxu0 %vm454_vm1, %v452_v8  ;;  %902 = vmatmul.mubr.msk.bf16.vlgmr.msra.gmra.mxu1 %vm454_vm1, %v505_v9  ;;  %s1122_s14 = scalar_lea.vmem %s1121_s11, 128  ;;  %p1123_p11 = scmp.lt.s32.totalorder %s1525_s9, %s1121_s11 }
  0x73   : > { %906 = vmatpush3.bf16.xpose.msra.mxu0 %v562_v10  ;;  %907 = vmatprep.mubr.msk.bf16.mxu0 %vm1267_vm0, %v1266_v0  ;;  %p1119_p5 = pneg %p1118_p8  ;;  %p1124_p12 = scmp.lt.s32.totalorder %s1122_s14, %s1116_s10 }
  0x75   : > { %p1125_p13 = por %p1124_p12, %p1123_p11 }
  0x77   : > { %p1126_p2 = pnand %p1125_p13, %p1119_p5 }
  0x7a   : > { %908 = vmatmul.mubr.msk.bf16.vlgmr.msra.gmra.mxu0 %vm454_vm1, %v556_v12 }
 0x132   : > { %v495_v13 = vpop.f32.mrf.mxu0  ;;  %v547_v14 = vpop.f32.mrf.mxu1 }
 0x133   : > { %v501_v15 = vpack.c.bf16 %v495_v13, %v495_v13  ;;  %v553_v16 = vpack.c.bf16 %v547_v14, %v547_v14 }
 0x134   : > { %v897_v17 = vpop.f32.mrf.mxu0  ;;  %v903_v18 = vpop.f32.mrf.mxu1 }
 0x135   : > { %554 = vst.msk [vmem:[%s442_s24] sm:$0xf] %vm502_vm2, %v553_v16  ;;  %503 = vst.msk [vmem:[%s435_s12] sm:$0xf] %vm502_vm2, %v501_v15 }
 0x136   : > { %v498_v19 = vpop.f32.mrf.mxu0  ;;  %v550_v20 = vpop.f32.mrf.mxu1 }
 0x137   : > { %1129 = shalt.err (!%p1126_p2)
}
 0x138   : > { %s1130_s19 = scalar_lea.hbm %s1523_s27, 64  ;;  %s1134_s12 = scalar_lea.hbm %s1640_s7, 128 }
 0x139   : > { %p1131_p4 = scmp.ne.s32.totalorder %s1523_s27, %s1130_s19  ;;  %p1135_p1 = scmp.lt.s32.totalorder %s1523_s27, %s1640_s7 }
 0x13a   : > { %p1136_p7 = scmp.lt.s32.totalorder %s1134_s12, %s1130_s19 }
 0x13b   : > { %p1132_p10 = pnand %p1131_p4, %p1675_p3 }
 0x13c   : > { %p1137_p6 = por %p1136_p7, %p1135_p1 }
 0x13d   : > { %p1133_p0 = pneg %p1132_p10 }
 0x13f   : > { %p1138_p9 = pnand %p1137_p6, %p1133_p0 }
 0x141   : > { %1141 = shalt.err (!%p1138_p9)
}
 0x142   : > { %922 = dma.vmem_to_hbm [thread:$0]  (%p1675_p3), %s1525_s9, 64, %s1523_s27, %s1539_s18  }
 0x143   : > { %s607_s30 = scalar_lea.sflag [#allocation4], %s1472_s15  ;;  %s1142_s25 = scalar_lea.vmem %s1533_s1, 64 }
 0x144   : > { %p1143_p8 = scmp.ne.s32.totalorder %s1533_s1, %s1142_s25  ;;  %s1269_s10 = smov [#allocation10]  }
 0x145   : > { %s1146_s20 = sshll.u32 %s1269_s10, 4  ;;  %s1147_s20 = int_to_ptr.vmem [resolvable:$false] %s1146_s20 }
 0x146   : > { %p1144_p5 = pnand %p1143_p8, %p1675_p3  ;;  %s1148_s11 = scalar_lea.vmem %s1147_s20, 128 }
 0x147   : > { %p1149_p12 = scmp.lt.s32.totalorder %s1533_s1, %s1147_s20  ;;  %p1150_p13 = scmp.lt.s32.totalorder %s1148_s11, %s1142_s25 }
 0x148   : > { %p1145_p11 = pneg %p1144_p5 }
 0x149   : > { %p1151_p2 = por %p1150_p13, %p1149_p12 }
 0x14b   : > { %p1152_p4 = pnand %p1151_p2, %p1145_p11 }
 0x14d   : > { %1155 = shalt.err (!%p1152_p4)
}
 0x14e   : > { %s1156_s9 = scalar_lea.hbm %s1531_s23, 64  ;;  %s1160_s14 = scalar_lea.hbm %s1639_s6, 128 }
 0x14f   : > { %p1157_p10 = scmp.ne.s32.totalorder %s1531_s23, %s1156_s9  ;;  %p1161_p7 = scmp.lt.s32.totalorder %s1531_s23, %s1639_s6 }
 0x150   : > { %p1162_p6 = scmp.lt.s32.totalorder %s1160_s14, %s1156_s9 }
 0x151   : > { %p1158_p0 = pnand %p1157_p10, %p1675_p3 }
 0x152   : > { %p1163_p9 = por %p1162_p6, %p1161_p7 }
 0x153   : > { %p1159_p1 = pneg %p1158_p0 }
 0x155   : > { %p1164_p8 = pnand %p1163_p9, %p1159_p1 }
 0x157   : > { %1167 = shalt.err (!%p1164_p8)
}
 0x158   : > { %921 = dma.vmem_to_hbm [thread:$0]  (%p1675_p3), %s1533_s1, 64, %s1531_s23, %s607_s30   ;;  %v898_v21 = vpop.f32.mrf.mxu0  ;;  %v904_v22 = vpop.f32.mrf.mxu1 }
 0x159   : > { %s449_s24 = scalar_lea.vmem [#allocation13], %s1512_s22  ;;  %s1588_s25 = scalar_lea.hbm %s1641_s8, %s1515_s13 }
 0x15a   : > { %s659_s12 = sshll.u32 %s449_s24, 4  ;;  %v598_v23 = vpop.f32.mrf.mxu0  ;;  %s1270_s1 = smov [#allocation13]   ;;  %s660_s12 = int_to_ptr.vmem [resolvable:$true] %s659_s12 }
 0x15b   : > { %v604_v24 = vpack.c.bf16 %v598_v23, %v598_v23  ;;  %s1168_s10 = scalar_lea.vmem %s660_s12, 64  ;;  %s1172_s22 = sshll.u32 %s1270_s1, 4  ;;  %s1173_s22 = int_to_ptr.vmem [resolvable:$false] %s1172_s22 }
 0x15c   : > { %v909_v25 = vpop.f32.mrf.mxu0  ;;  %p1169_p5 = scmp.ne.s32.totalorder %s660_s12, %s1168_s10  ;;  %s1174_s23 = scalar_lea.vmem %s1173_s22, 128 }
 0x15d   : > { %605 = vst.msk [vmem:[%s449_s24] sm:$0xf] %vm502_vm2, %v604_v24  ;;  %p1175_p13 = scmp.lt.s32.totalorder %s660_s12, %s1173_s22  ;;  %p1176_p2 = scmp.lt.s32.totalorder %s1174_s23, %s1168_s10 }
 0x15e   : > { %v601_v26 = vpop.f32.mrf.mxu0  ;;  %p1170_p11 = pnand %p1169_p5, %p1675_p3 }
 0x15f   : > { %p1177_p4 = por %p1176_p2, %p1175_p13 }
 0x160   : > { %p1171_p12 = pneg %p1170_p11 }
 0x162   : > { %p1178_p10 = pnand %p1177_p4, %p1171_p12 }
 0x164   : > { %1181 = shalt.err (!%p1178_p10)
}
 0x165   : > { %s1182_s13 = scalar_lea.hbm %s1588_s25, 64  ;;  %s1186_s11 = scalar_lea.hbm %s1641_s8, 128 }
 0x166   : > { %p1183_p0 = scmp.ne.s32.totalorder %s1588_s25, %s1182_s13  ;;  %p1187_p6 = scmp.lt.s32.totalorder %s1588_s25, %s1641_s8 }
 0x167   : > { %p1188_p9 = scmp.lt.s32.totalorder %s1186_s11, %s1182_s13 }
 0x168   : > { %p1184_p1 = pnand %p1183_p0, %p1675_p3 }
 0x169   : > { %p1189_p8 = por %p1188_p9, %p1187_p6 }
 0x16a   : > { %p1185_p7 = pneg %p1184_p1 }
 0x16c   : > { %p1190_p5 = pnand %p1189_p8, %p1185_p7 }
 0x16e   : > { %1193 = shalt.err (!%p1190_p5)
}
 0x16f   : > { %923 = dma.vmem_to_hbm [thread:$0]  (%p1675_p3), %s660_s12, 64, %s1588_s25, %s1539_s18   ;;  %v910_v27 = vpop.f32.mrf.mxu0 }
 0x170 PF: > { %s1676_s27 = sld [smem:[#allocation19_spill]] }
 0x171   : > { %s1677_s14 = sld [smem:[#allocation24_spill]] }
 0x172   : > { %s1678_s19 = sld [smem:[#allocation21_spill]] }
 0x176   : > { %s671_s17 = sand.u32 1, %s1676_s27  }
 0x177   : > { %p1679_p11 = scmp.ne.s32.totalorder %s1677_s14, 0  ;;  %s672_s24 = scalar_lea.sflag [#allocation4], %s671_s17 }
 0x178   : > { %p1680_p12 = scmp.ge.s32.totalorder %s1678_s19, 2 }
 0x17a   : > { %p942_p13 = pnand %p1680_p12, %p1679_p11 }
 0x17c   : > { %p943_p2 = pneg %p942_p13 }
 0x17e   : > { %1231 = dma.done.wait (%p943_p2), %s672_s24, 64  }
 0x17f   : > { %1233 = vsyncadd (%p943_p2), %s672_s24, 4294967232  ;;  %s1681_s16 = sadd.s32 4294967294, %s1678_s19  }
 0x180   : > { %s680_s26 = sand.u32 1, %s1681_s16  }
 0x181   : > { %s681_s21 = scalar_lea.sflag [#allocation12], %s680_s26 }
 0x182   : > { %1235 = dma.done.wait (%p943_p2), %s681_s21, 128  }
 0x183   : > { %1237 = vsyncadd (%p943_p2), %s681_s21, 4294967168  ;;  %s32_s10 = sadd.s32 1, %s1678_s19   ;;  %s1682_s18 = sld [smem:[#allocation23_spill]] }
 0x184   : > { %p29_p3 = scmp.ge.s32.totalorder %s32_s10, 4   ;;  %s1683_s30 = sld [smem:[#allocation20_spill]] }
 0x185   : > { %s1684_s9 = sld [smem:[#allocation22_spill]]  ;;  %s1685_s27 = smov %s1244_s28 }
 0x186   : > { %s1686_s28 = smov %s1248_s29  ;;  %31 = sbr.rel (!%p29_p3) target bundleno = 13 (0xd), region = 149 }
 0x189   : > { %s1687_s29 = smov %s1682_s18 }
 0x18b   :  { %695 = vsyncpa [#allocation3], 1 }
 0x18c   :  { %697 = vsyncpa [#allocation3 + $0x1], 1 }
 0x18d   :  { %698 = vsyncpa [#allocation6], 1 }
 0x18e   :  { %700 = vsyncpa [#allocation6 + $0x1], 1 }
 0x18f   :  { %701 = vsyncpa [#allocation9], 1 }
 0x190   :  { %702 = vsyncpa [#allocation4], 1 }
 0x191   :  { %704 = vsyncpa [#allocation4 + $0x1], 1 }
 0x192   :  { %705 = vsyncpa [#allocation12], 1 }
 0x193   :  { %707 = vsyncpa [#allocation12 + $0x1], 1 }

</bundles_post_ra>
